<compile_context>
chip_gen: v6e
topology: v6e:2x2x1
jax: 0.10.0
libtpu: 0.0.40
codegen_flags: <defaults>
</compile_context>

<pallas_src>
import jax
import jax.numpy as jnp
from jax.experimental import pallas as pl
from jax.experimental.pallas import tpu as pltpu


def _round_up(x, m):
    return ((x + m - 1) // m) * m


def _patch_embed_kernel(xp_ref, w_ref, b_ref, o_ref):
    # MXU matmul on bf16 operands with f32 accumulation, VPU bias add in f32.
    acc = jnp.dot(xp_ref[...], w_ref[...], preferred_element_type=jnp.float32)
    o_ref[...] = (acc + b_ref[...]).astype(o_ref.dtype)


def patch_embed_forward(x, weight, bias, patch_size, *, tm=256, tn=256):
    """Pallas implementation of PatchEmbed.forward.

    x:      (B, C, H, W)  float32, NCHW like PyTorch
    weight: (E, C, p, p)  Conv2d weight
    bias:   (E,)          Conv2d bias
    returns (B, num_patches, E)
    """
    B, C, H, W = x.shape
    E = weight.shape[0]
    p = patch_size
    assert H % p == 0 and W % p == 0
    gh, gw = H // p, W // p
    num_patches = gh * gw

    # --- glue: extract non-overlapping patches, flatten in (c, ph, pw) order
    # to exactly match the Conv2d weight layout.  Layout plumbing only.
    # TODO(synk): could be folded into the kernel (grid over (B, gh)) to avoid
    # the HBM round-trip of the transpose; kept in JAX for robustness here.
    xp = x.reshape(B, C, gh, p, gw, p)
    xp = jnp.transpose(xp, (0, 2, 4, 1, 3, 5))
    xp = xp.reshape(B * num_patches, C * p * p)

    # Conv2d weight (E, C, p, p) -> matmul weight (K, E)
    w_mat = jnp.transpose(weight.reshape(E, C * p * p))

    M, K = xp.shape

    # bf16 operands (MXU native on v5e/v6e/v7x); accumulation stays f32.
    xp_bf = xp.astype(jnp.bfloat16)
    w_bf = w_mat.astype(jnp.bfloat16)
    b_f32 = bias.astype(jnp.float32).reshape(1, E)

    # --- tiling ---------------------------------------------------------
    # Lane-dense output: pad embed dim to a multiple of 128.
    N_pad = _round_up(max(E, 128), 128)
    TN = _round_up(min(tn, N_pad), 128)
    if N_pad % TN != 0:
        TN = 128  # 128 always divides N_pad

    # M tiling: prefer `tm`, shrink for small problems; sublane multiple of 8.
    TM = _round_up(min(tm, _round_up(M, 8)), 8)
    M_pad = _round_up(M, TM)

    # Zero-pad operands to the tiled shapes (padded rows/cols sliced off below).
    if M_pad != M:
        xp_bf = jnp.pad(xp_bf, ((0, M_pad - M), (0, 0)))
    if N_pad != E:
        w_bf = jnp.pad(w_bf, ((0, 0), (0, N_pad - E)))
        b_f32 = jnp.pad(b_f32, ((0, 0), (0, N_pad - E)))

    grid = (M_pad // TM, N_pad // TN)

    # Explicit VMEM budget: double-buffered bf16 input tiles + f32 output tile
    # + bias, with 2x headroom.  Keeps pipelining alive on v5e (16 MiB scoped
    # default) and within v7x's 64 MiB physical VMEM.
    tile_bytes = (
        2 * (TM * K * 2)      # xp tile, double-buffered, bf16
        + 2 * (K * TN * 2)    # weight tile, double-buffered, bf16
        + 2 * (TN * 4)        # bias tile
        + 2 * (TM * TN * 4)   # output tile, double-buffered, f32
    )
    vmem_limit = int(min(max(2 * tile_bytes, 16 * 1024 * 1024), 64 * 1024 * 1024))

    cost = pl.CostEstimate(
        flops=2 * M_pad * K * N_pad,
        transcendentals=0,
        bytes_accessed=(
            M_pad * K * 2 + K * N_pad * 2 + N_pad * 4 + M_pad * N_pad * 4
        ),
    )

    out = pl.pallas_call(
        _patch_embed_kernel,
        out_shape=jax.ShapeDtypeStruct((M_pad, N_pad), x.dtype),
        grid_spec=pltpu.PrefetchScalarGridSpec(
            num_scalar_prefetch=0,
            grid=grid,
            in_specs=[
                pl.BlockSpec((TM, K), lambda i, j: (i, 0)),   # patches
                pl.BlockSpec((K, TN), lambda i, j: (0, j)),   # weight
                pl.BlockSpec((1, TN), lambda i, j: (0, j)),   # bias
            ],
            out_specs=pl.BlockSpec((TM, TN), lambda i, j: (i, j)),
        ),
        compiler_params=pltpu.CompilerParams(
            dimension_semantics=("parallel", "parallel"),
            vmem_limit_bytes=vmem_limit,
        ),
        cost_estimate=cost,
    )(xp_bf, w_bf, b_f32)

    # Slice off M/N padding and reshape to the PyTorch-equivalent output.
    out = out[:M, :E]
    return out.reshape(B, num_patches, E)


if __name__ == "__main__":
    # Small shapes consistent with the module's forward:
    #   img_size=16, patch_size=4, in_chans=4, embed_dim=32, batch=2
    B, C, H, W = 2, 4, 16, 16
    patch = 4
    embed_dim = 32

    key = jax.random.PRNGKey(0)
    kx, kw, kb = jax.random.split(key, 3)

    x = jax.random.normal(kx, (B, C, H, W), dtype=jnp.float32)
    # Deterministic synthetic Conv2d parameters (shapes from nn.Conv2d init).
    weight = jax.random.normal(kw, (embed_dim, C, patch, patch), dtype=jnp.float32) * 0.02
    bias = jax.random.normal(kb, (embed_dim,), dtype=jnp.float32) * 0.02

    out = patch_embed_forward(x, weight, bias, patch)
    out = jax.block_until_ready(out)

    # Sanity check against a pure-JAX f32 reference (lax conv == nn.Conv2d).
    # Tolerance relaxed for the bf16 operand cast (f32 accumulation).
    ref = jax.lax.conv_general_dilated(
        x, weight, window_strides=(patch, patch), padding="VALID",
        dimension_numbers=("NCHW", "OIHW", "NCHW"),
    ) + bias[None, :, None, None]
    ref = ref.reshape(B, embed_dim, -1).transpose(0, 2, 1)

    assert out.shape == (B, (H // patch) * (W // patch), embed_dim)
    assert jnp.allclose(out, ref, atol=1e-2, rtol=1e-2), float(
        jnp.max(jnp.abs(out - ref))
    )

    print("KERNEL_OK")
</pallas_src>

<mosaic_0001>
module attributes {stable_mosaic.version = 11 : i64} {
  func.func @_patch_embed_kernel(%arg0: i32, %arg1: i32, %arg2: memref<32x64xbf16, #tpu.memory_space<vmem>>, %arg3: memref<64x128xbf16, #tpu.memory_space<vmem>>, %arg4: memref<1x128xf32, #tpu.memory_space<vmem>>, %arg5: memref<32x128xf32, #tpu.memory_space<vmem>>) attributes {dimension_semantics = [#tpu.dimension_semantics<parallel>, #tpu.dimension_semantics<parallel>], iteration_bounds = array<i64: 1, 1>, scalar_prefetch = 0 : i64, scratch_operands = 0 : i64, tpu.core_type = #tpu.core_type<tc>, window_params = [{transform_indices = @transform_0, window_bounds = array<i64: 32, 64>}, {transform_indices = @transform_1, window_bounds = array<i64: 64, 128>}, {transform_indices = @transform_2, window_bounds = array<i64: 1, 128>}, {transform_indices = @transform_3, window_bounds = array<i64: 32, 128>}]} {
    %c0 = arith.constant 0 : index
    %c0_0 = arith.constant 0 : index
    %0 = vector.load %arg2[%c0, %c0_0] : memref<32x64xbf16, #tpu.memory_space<vmem>>, vector<32x64xbf16>
    %c0_1 = arith.constant 0 : index
    %c0_2 = arith.constant 0 : index
    %1 = vector.load %arg3[%c0_1, %c0_2] : memref<64x128xbf16, #tpu.memory_space<vmem>>, vector<64x128xbf16>
    %cst = arith.constant dense<0.000000e+00> : vector<32x128xf32>
    %2 = tpu.matmul %0, %1, %cst {dimension_numbers = #tpu.dot_dimension_numbers<[1], [0], [0], [1], [0, 0, 1, 1], [], []>} : vector<32x64xbf16>, vector<64x128xbf16>, vector<32x128xf32> -> vector<32x128xf32>
    %c0_3 = arith.constant 0 : index
    %c0_4 = arith.constant 0 : index
    %3 = vector.load %arg4[%c0_3, %c0_4] : memref<1x128xf32, #tpu.memory_space<vmem>>, vector<1x128xf32>
    %4 = vector.broadcast %3 : vector<1x128xf32> to vector<32x128xf32>
    %5 = arith.addf %2, %4 : vector<32x128xf32>
    %c0_5 = arith.constant 0 : index
    %c0_6 = arith.constant 0 : index
    %6 = vector.load %arg5[%c0_5, %c0_6] : memref<32x128xf32, #tpu.memory_space<vmem>>, vector<32x128xf32>
    tpu.vector_store %arg5[%c0_5, %c0_6], %5 {strides = array<i32>} : memref<32x128xf32, #tpu.memory_space<vmem>>, vector<32x128xf32>,
    return
  }
  func.func @transform_0(%arg0: i32, %arg1: i32) -> (i32, i32) {
    %c0_i32 = arith.constant 0 : i32
    %c0_i32_0 = arith.constant 0 : i32
    return %arg0, %c0_i32 : i32, i32
  }
  func.func @transform_1(%arg0: i32, %arg1: i32) -> (i32, i32) {
    %c0_i32 = arith.constant 0 : i32
    %c0_i32_0 = arith.constant 0 : i32
    return %c0_i32, %arg1 : i32, i32
  }
  func.func @transform_2(%arg0: i32, %arg1: i32) -> (i32, i32) {
    %c0_i32 = arith.constant 0 : i32
    %c0_i32_0 = arith.constant 0 : i32
    return %c0_i32, %arg1 : i32, i32
  }
  func.func @transform_3(%arg0: i32, %arg1: i32) -> (i32, i32) {
    %c0_i32 = arith.constant 0 : i32
    return %arg0, %arg1 : i32, i32
  }
}

</mosaic_0001>

<bundles_post_ra>
// kernel: tpu_custom_call.1
= control target key start
LH: loop header
LB: loop body
LE: loop exit
PB: predicated region body
PF: predicated region fallthrough
CT: control target
= control target key end

     0   :  { %8 = vsyncpa [#allocation3], 0  ;;  %s320_s0 = inlined_call_operand.hbm [shape: bf16[32,64], index: 0, kind: input, shape index: {}]   ;;  %s321_s1 = inlined_call_operand.hbm [shape: bf16[64,128], index: 1, kind: input, shape index: {}]   ;;  %s322_s2 = inlined_call_operand.vmem [shape: f32[1,128], index: 2, kind: input, shape index: {}]   ;;  %s323_s3 = inlined_call_operand.hbm [shape: f32[32,128], index: 3, kind: output, shape index: {}]  }
   0x1   :  { %9 = vsyncpa [#allocation6], 0 }
   0x2   :  { %10 = vsyncpa [#allocation4], 0  ;;  %s281_s12 = smov [#allocation2]  }
   0x3   :  { %s16_s13 = sshll.u32 %s281_s12, 4  ;;  %s17_s13 = int_to_ptr.vmem [resolvable:$true] %s16_s13 }
   0x4   :  { %s223_s14 = scalar_lea.vmem %s17_s13, 256  ;;  %p228_p1 = scmp.lt.s32.totalorder %s17_s13, %s17_s13 }
   0x5   :  { %p224_p0 = scmp.ne.s32.totalorder %s17_s13, %s223_s14  ;;  %p229_p2 = scmp.lt.s32.totalorder %s223_s14, %s223_s14 }
   0x7   :  { %p230_p3 = por %p229_p2, %p228_p1 }
   0x9   :  { %p231_p4 = pnand %p230_p3, %p224_p0 }
   0xb   :  { %234 = shalt.err (!%p231_p4)
}
   0xc   :  { %s282_s15 = smov 64   ;;  %s283_s16 = smov 4  }
   0xd   :  { %22 = dma.hbm_to_vmem [thread:$0]  %s320_s0, 256, %s17_s13, [#allocation3], %s282_s15, %s282_s15, %s283_s16  }
   0xe   :  { %s284_s19 = smov [#allocation5]  }
   0xf   :  { %s28_s20 = sshll.u32 %s284_s19, 4  ;;  %s29_s20 = int_to_ptr.vmem [resolvable:$true] %s28_s20 }
  0x10   :  { %s243_s21 = scalar_lea.vmem %s29_s20, 512  ;;  %p248_p6 = scmp.lt.s32.totalorder %s29_s20, %s29_s20 }
  0x11   :  { %p244_p5 = scmp.ne.s32.totalorder %s29_s20, %s243_s21  ;;  %p249_p7 = scmp.lt.s32.totalorder %s243_s21, %s243_s21 }
  0x13   :  { %p250_p8 = por %p249_p7, %p248_p6 }
  0x15   :  { %p251_p9 = pnand %p250_p8, %p244_p5 }
  0x17   :  { %254 = shalt.err (!%p251_p9)
}
  0x18   :  { %34 = dma.hbm_to_vmem [thread:$0]  %s321_s1, 512, %s29_s20, [#allocation6], %s282_s15, %s282_s15, %s283_s16  }
  0x19   :  { %275 = dma.done.wait [#allocation3], 256  }
  0x1a   :  { %276 = vsyncadd [#allocation3], 4294967040 }
  0x1b   :  { %277 = dma.done.wait [#allocation6], 512  }
  0x1c   :  { %278 = vsyncadd [#allocation6], 4294966784  ;;  %v209_v0 = vld [vmem:[#allocation5 + $0x18] sm:$0xff]   ;;  %v210_v1 = vld [vmem:[#allocation5 + $0x10] sm:$0xff]   ;;  %vm97_vm0 = vcmask 523264   ;;  %s285_s24 = smov [#allocation7]  }
  0x1d   :  { %190 = vmatprep.subr.bf16.mxu0 %v209_v0  ;;  %v211_v2 = vld [vmem:[#allocation5 + $0x8] sm:$0xff]   ;;  %v213_v3 = vld [vmem:[#allocation2] sm:$0xff]   ;;  %v212_v4 = vld [vmem:[#allocation5] sm:$0xff]   ;;  %s162_s25 = sshll.u32 %s285_s24, 4  ;;  %s163_s25 = int_to_ptr.vmem [resolvable:$true] %s162_s25 }
  0x1e   :  { %191 = vmatpush3.bf16.msra.mxu0 %v209_v0  ;;  %198 = vmatprep.mubr.msk.bf16.mxu0 %vm97_vm0, %v213_v3  ;;  %v214_v5 = vld [vmem:[#allocation2 + $0x8] sm:$0xff]   ;;  %v175_v6 = vld [vmem:[%s322_s2] ss:$0 sm:$0xff]  ;;  %s255_s26 = scalar_lea.vmem %s163_s25, 512  ;;  %p260_p11 = scmp.lt.s32.totalorder %s163_s25, %s163_s25 }
  0x1f   :  { %192 = vmatprep.subr.bf16.mxu0 %v210_v1  ;;  %p256_p10 = scmp.ne.s32.totalorder %s163_s25, %s255_s26  ;;  %p261_p12 = scmp.lt.s32.totalorder %s255_s26, %s255_s26 }
  0x21   :  { %p262_p13 = por %p261_p12, %p260_p11 }
  0x22   :  { %193 = vmatpush3.bf16.msra.mxu0 %v210_v1 }
  0x23   :  { %194 = vmatprep.subr.bf16.mxu0 %v211_v2  ;;  %p263_p0 = pnand %p262_p13, %p256_p10 }
  0x26   :  { %195 = vmatpush3.bf16.msra.mxu0 %v211_v2 }
  0x27   :  { %196 = vmatprep.subr.bf16.mxu0 %v212_v4 }
  0x2a   :  { %197 = vmatpush3.bf16.msra.mxu0 %v212_v4 }
  0x2d   :  { %199 = vmatmul.mubr.msk.bf16.vlgmr.msra.gmra.mxu0 %vm97_vm0, %v214_v5 }
  0xed   :  { %v200_v7 = vpop.f32.mrf.mxu0 }
  0xee   :  { %v147_v8 = vadd.f32 %v200_v7, %v175_v6 }
  0xef   :  { %v138_v9 = vpop.f32.mrf.mxu0 }
  0xf0   :  { %155 = vst [vmem:[#allocation7 + $0x10] sm:$0xff] %v147_v8  ;;  %v139_v10 = vadd.f32 %v175_v6, %v138_v9 }
  0xf1   :  { %v201_v11 = vpop.f32.mrf.mxu0 }
  0xf2   :  { %153 = vst [vmem:[#allocation7] sm:$0xff] %v139_v10  ;;  %v150_v12 = vadd.f32 %v201_v11, %v175_v6 }
  0xf3   :  { %v141_v13 = vpop.f32.mrf.mxu0 }
  0xf4   :  { %156 = vst [vmem:[#allocation7 + $0x18] sm:$0xff] %v150_v12  ;;  %v142_v14 = vadd.f32 %v175_v6, %v141_v13 }
  0xf6   :  { %154 = vst [vmem:[#allocation7 + $0x8] sm:$0xff] %v142_v14 }
  0xf7   :  { %266 = shalt.err (!%p263_p0)
}
  0xf8   :  { %s286_s2 = smov 128   ;;  %s287_s27 = smov 8  }
  0xf9   :  { %168 = dma.vmem_to_hbm [thread:$0]  %s163_s25, 512, %s323_s3, [#allocation4], %s286_s2, %s286_s2, %s287_s27  }
  0xfa   :  { %279 = dma.done.wait [#allocation4], 512  }
  0xfb   :  { %280 = vsyncadd [#allocation4], 4294966784 }
  0xfc   :  { %172 = vsyncpa [#allocation3], 1 }
  0xfd   :  { %173 = vsyncpa [#allocation6], 1 }
  0xfe   :  { %174 = vsyncpa [#allocation4], 1 }

</bundles_post_ra>
